<compile_context>
chip_gen: v5e
topology: v5e:2x2
jax: 0.10.0
libtpu: 0.0.40
codegen_flags: <defaults>
</compile_context>

<pallas_src>
import functools

import jax
import jax.numpy as jnp
from jax import lax
from jax.experimental import pallas as pl
from jax.experimental.pallas import tpu as pltpu


def _cln_kernel(x_ref, gain_ref, bias_ref, tri_ref, o_ref, carry_ref, *,
                eps, channels, time_tile):
    t_idx = pl.program_id(1)

    # Reset the running totals at the start of each batch element's time sweep.
    @pl.when(t_idx == 0)
    def _():
        carry_ref[...] = jnp.zeros_like(carry_ref)

    x = x_ref[...].astype(jnp.float32)                      # (C, Tt)

    # Per-time-step channel sums of x and x^2, stacked as one (2, Tt) MXU operand.
    s1 = jnp.sum(x, axis=0, keepdims=True)                  # (1, Tt)
    s2 = jnp.sum(x * x, axis=0, keepdims=True)              # (1, Tt)
    stacked = jnp.concatenate([s1, s2], axis=0)             # (2, Tt)

    # In-tile inclusive prefix sum via one small (Tt, Tt) triangular matmul,
    # then add the carry (running totals from previous time tiles).
    cum = jnp.dot(stacked, tri_ref[...],
                  preferred_element_type=jnp.float32)       # (2, Tt)
    cum = cum + carry_ref[...]                              # carry: (2, 1), lane-bcast

    # Persist running totals (inclusive through this tile) for the next time tile.
    carry_ref[...] = cum[:, time_tile - 1:time_tile]

    cum_sum = cum[0:1, :]                                   # (1, Tt)
    cum_pow_sum = cum[1:2, :]                               # (1, Tt)

    # entry_cnt = (global_time_index + 1) * C; only a (1, Tt) row, divides are cheap.
    gidx = lax.broadcasted_iota(jnp.int32, (1, time_tile), 1) + t_idx * time_tile + 1
    entry_cnt = gidx.astype(jnp.float32) * jnp.float32(channels)

    cum_mean = cum_sum / entry_cnt
    cum_var = (cum_pow_sum - 2.0 * cum_mean * cum_sum) / entry_cnt + cum_mean * cum_mean
    cum_var = jnp.maximum(cum_var, 0.0)                     # guard f32 cancellation
    inv_std = lax.rsqrt(cum_var + jnp.float32(eps))         # (1, Tt) rsqrt only

    gain = gain_ref[...].astype(jnp.float32)                # (C, 1)
    bias = bias_ref[...].astype(jnp.float32)                # (C, 1)

    out = (x - cum_mean) * inv_std * gain + bias            # all broadcast multiplies
    o_ref[...] = out.astype(o_ref.dtype)


def _pick_time_tile(T):
    # Lane-aligned time tile (multiple of 128, <= 256 so the tri block stays tiny).
    # If T is not a multiple of 128 (e.g. tiny test shapes), fall back to the full
    # time extent (block == full array dim is always legal).  Production T should be
    # a multiple of 128 for lane-dense stores.
    for tt in (256, 128):
        if T % tt == 0:
            return tt
    return T


def cln_forward(x, gain, bias, eps=1e-8):
    """x: (B, C, T); gain, bias: (1, C, 1). Returns (B, C, T)."""
    B, C, T = x.shape
    Tt = _pick_time_tile(T)
    n_t = T // Tt

    gain2d = gain.reshape(C, 1)
    bias2d = bias.reshape(C, 1)

    # Lower-triangular-transposed prefix matrix: tri[s, t] = 1 if s <= t.
    tri = (jnp.arange(Tt)[:, None] <= jnp.arange(Tt)[None, :]).astype(jnp.float32)

    kernel = functools.partial(_cln_kernel, eps=eps, channels=C, time_tile=Tt)

    return pl.pallas_call(
        kernel,
        out_shape=jax.ShapeDtypeStruct((B, C, T), x.dtype),
        grid=(B, n_t),
        in_specs=[
            pl.BlockSpec((pl.Squeezed(), C, Tt), lambda b, t: (b, 0, t)),
            pl.BlockSpec((C, 1), lambda b, t: (0, 0)),
            pl.BlockSpec((C, 1), lambda b, t: (0, 0)),
            pl.BlockSpec((Tt, Tt), lambda b, t: (0, 0)),
        ],
        out_specs=pl.BlockSpec((pl.Squeezed(), C, Tt), lambda b, t: (b, 0, t)),
        scratch_shapes=[pltpu.VMEM((2, 1), jnp.float32)],
        compiler_params=pltpu.CompilerParams(
            dimension_semantics=("parallel", "arbitrary"),
        ),
    )(x, gain2d, bias2d, tri)


def cln_reference(x, gain, bias, eps=1e-8):
    # Pure-JAX reference mirroring the PyTorch forward exactly.
    B, C, T = x.shape
    step_sum = x.sum(axis=1)                 # (B, T)
    step_pow_sum = (x ** 2).sum(axis=1)      # (B, T)
    cum_sum = jnp.cumsum(step_sum, axis=1)
    cum_pow_sum = jnp.cumsum(step_pow_sum, axis=1)
    entry_cnt = jnp.arange(C, C * (T + 1), C, dtype=x.dtype).reshape(1, -1)
    cum_mean = cum_sum / entry_cnt
    cum_var = (cum_pow_sum - 2 * cum_mean * cum_sum) / entry_cnt + cum_mean ** 2
    cum_std = jnp.sqrt(cum_var + eps)
    cum_mean = cum_mean[:, None, :]
    cum_std = cum_std[:, None, :]
    out = (x - cum_mean) / cum_std
    return out * gain + bias


if __name__ == "__main__":
    key = jax.random.PRNGKey(0)

    # --- small test, shapes implied by the module: (batch=2, channels=4, time=16) ---
    B, C, T = 2, 4, 16
    x = jax.random.normal(key, (B, C, T), dtype=jnp.float32)
    gain = jnp.ones((1, C, 1), dtype=jnp.float32)
    bias = jnp.zeros((1, C, 1), dtype=jnp.float32)

    out = jax.block_until_ready(cln_forward(x, gain, bias))
    ref = cln_reference(x, gain, bias)
    assert out.shape == (B, C, T)
    assert jnp.allclose(out, ref, atol=1e-5, rtol=1e-5), "small-shape mismatch vs reference"

    # --- second check exercising the tiled time axis + cross-tile carry (T // Tt = 3) ---
    B2, C2, T2 = 2, 8, 384
    k1, k2 = jax.random.split(key)
    x2 = jax.random.normal(k1, (B2, C2, T2), dtype=jnp.float32)
    gain2 = 1.0 + 0.1 * jax.random.normal(k2, (1, C2, 1), dtype=jnp.float32)
    bias2 = 0.1 * jnp.ones((1, C2, 1), dtype=jnp.float32)

    out2 = jax.block_until_ready(cln_forward(x2, gain2, bias2))
    ref2 = cln_reference(x2, gain2, bias2)
    assert out2.shape == (B2, C2, T2)
    assert jnp.allclose(out2, ref2, atol=1e-4, rtol=1e-4), "tiled-T mismatch vs reference"

    print("KERNEL_OK")
</pallas_src>

<mosaic_0001>
module attributes {stable_mosaic.version = 11 : i64} {
  func.func @_cln_kernel(%arg0: i32, %arg1: i32, %arg2: memref<1x4x16xf32, #tpu.memory_space<vmem>>, %arg3: memref<4x1xf32, #tpu.memory_space<vmem>>, %arg4: memref<4x1xf32, #tpu.memory_space<vmem>>, %arg5: memref<16x16xf32, #tpu.memory_space<vmem>>, %arg6: memref<1x4x16xf32, #tpu.memory_space<vmem>>, %arg7: memref<2x1xf32, #tpu.memory_space<vmem>>) attributes {dimension_semantics = [#tpu.dimension_semantics<parallel>, #tpu.dimension_semantics<arbitrary>], iteration_bounds = array<i64: 2, 1>, scalar_prefetch = 0 : i64, scratch_operands = 1 : i64, tpu.core_type = #tpu.core_type<tc>, window_params = [{transform_indices = @transform_0, window_bounds = array<i64: 1, 4, 16>}, {pipeline_mode = #tpu.pipeline_mode<synchronous>, transform_indices = @transform_1, window_bounds = array<i64: 4, 1>}, {pipeline_mode = #tpu.pipeline_mode<synchronous>, transform_indices = @transform_2, window_bounds = array<i64: 4, 1>}, {pipeline_mode = #tpu.pipeline_mode<synchronous>, transform_indices = @transform_3, window_bounds = array<i64: 16, 16>}, {transform_indices = @transform_4, window_bounds = array<i64: 1, 4, 16>}]} {
    %c0_i32 = arith.constant 0 : i32
    %0 = arith.cmpi eq, %arg1, %c0_i32 : i32
    %1 = arith.extui %0 : i1 to i32
    %c0_i32_0 = arith.constant 0 : i32
    %2 = arith.cmpi ne, %1, %c0_i32_0 : i32
    scf.if %2 {
      %cst_22 = arith.constant 0.000000e+00 : f32
      %55 = vector.broadcast %cst_22 : f32 to vector<2x1xf32>
      %c0_23 = arith.constant 0 : index
      %c0_24 = arith.constant 0 : index
      %56 = vector.load %arg7[%c0_23, %c0_24] : memref<2x1xf32, #tpu.memory_space<vmem>>, vector<2x1xf32>
      tpu.vector_store %arg7[%c0_23, %c0_24], %55 {strides = array<i32>} : memref<2x1xf32, #tpu.memory_space<vmem>>, vector<2x1xf32>,
    } else {
    }
    %c0 = arith.constant 0 : index
    %c0_1 = arith.constant 0 : index
    %c0_2 = arith.constant 0 : index
    %3 = vector.load %arg2[%c0, %c0_1, %c0_2] : memref<1x4x16xf32, #tpu.memory_space<vmem>>, vector<1x4x16xf32>
    %4 = vector.shape_cast %3 : vector<1x4x16xf32> to vector<4x16xf32>
    %cst = arith.constant dense<0.000000e+00> : vector<16xf32>
    %5 = vector.multi_reduction <add>, %4, %cst [0] : vector<4x16xf32> to vector<16xf32>
    %6 = vector.shape_cast %5 : vector<16xf32> to vector<1x16xf32>
    %7 = arith.mulf %4, %4 : vector<4x16xf32>
    %cst_3 = arith.constant dense<0.000000e+00> : vector<16xf32>
    %8 = vector.multi_reduction <add>, %7, %cst_3 [0] : vector<4x16xf32> to vector<16xf32>
    %9 = vector.shape_cast %8 : vector<16xf32> to vector<1x16xf32>
    %10 = tpu.concatenate %6, %9 in 0 : vector<1x16xf32>, vector<1x16xf32> -> vector<2x16xf32>
    %c0_4 = arith.constant 0 : index
    %c0_5 = arith.constant 0 : index
    %11 = vector.load %arg5[%c0_4, %c0_5] : memref<16x16xf32, #tpu.memory_space<vmem>>, vector<16x16xf32>
    %cst_6 = arith.constant dense<0.000000e+00> : vector<2x16xf32>
    %12 = tpu.matmul %10, %11, %cst_6 {dimension_numbers = #tpu.dot_dimension_numbers<[1], [0], [0], [1], [0, 0, 1, 1], [], []>} : vector<2x16xf32>, vector<16x16xf32>, vector<2x16xf32> -> vector<2x16xf32>
    %c0_7 = arith.constant 0 : index
    %c0_8 = arith.constant 0 : index
    %13 = vector.load %arg7[%c0_7, %c0_8] : memref<2x1xf32, #tpu.memory_space<vmem>>, vector<2x1xf32>
    %14 = vector.broadcast %13 : vector<2x1xf32> to vector<2x16xf32>
    %15 = arith.addf %12, %14 : vector<2x16xf32>
    %16 = vector.extract_strided_slice %15 {offsets = [0, 15], sizes = [2, 1], strides = [1, 1]} : vector<2x16xf32> to vector<2x1xf32>
    %c0_9 = arith.constant 0 : index
    %c0_10 = arith.constant 0 : index
    %17 = vector.load %arg7[%c0_9, %c0_10] : memref<2x1xf32, #tpu.memory_space<vmem>>, vector<2x1xf32>
    tpu.vector_store %arg7[%c0_9, %c0_10], %16 {strides = array<i32>} : memref<2x1xf32, #tpu.memory_space<vmem>>, vector<2x1xf32>,
    %18 = vector.extract_strided_slice %15 {offsets = [0, 0], sizes = [1, 16], strides = [1, 1]} : vector<2x16xf32> to vector<1x16xf32>
    %19 = vector.extract_strided_slice %15 {offsets = [1, 0], sizes = [1, 16], strides = [1, 1]} : vector<2x16xf32> to vector<1x16xf32>
    %20 = tpu.iota {dimensions = array<i32: 1>} : vector<1x16xi32>
    %c16_i32 = arith.constant 16 : i32
    %21 = arith.muli %arg1, %c16_i32 : i32
    %22 = vector.broadcast %21 : i32 to vector<1x16xi32>
    %23 = arith.addi %20, %22 : vector<1x16xi32>
    %c1_i32 = arith.constant 1 : i32
    %24 = vector.broadcast %c1_i32 : i32 to vector<1x16xi32>
    %25 = arith.addi %23, %24 : vector<1x16xi32>
    %26 = arith.sitofp %25 : vector<1x16xi32> to vector<1x16xf32>
    %cst_11 = arith.constant 4.000000e+00 : f32
    %27 = vector.broadcast %cst_11 : f32 to vector<1x16xf32>
    %28 = arith.mulf %26, %27 : vector<1x16xf32>
    %29 = arith.divf %18, %28 : vector<1x16xf32>
    %cst_12 = arith.constant 2.000000e+00 : f32
    %30 = vector.broadcast %cst_12 : f32 to vector<1x16xf32>
    %31 = arith.mulf %30, %29 : vector<1x16xf32>
    %32 = arith.mulf %31, %18 : vector<1x16xf32>
    %33 = arith.subf %19, %32 : vector<1x16xf32>
    %34 = arith.divf %33, %28 : vector<1x16xf32>
    %35 = arith.mulf %29, %29 : vector<1x16xf32>
    %36 = arith.addf %34, %35 : vector<1x16xf32>
    %cst_13 = arith.constant 0.000000e+00 : f32
    %37 = vector.broadcast %cst_13 : f32 to vector<1x16xf32>
    %38 = arith.maximumf %36, %37 : vector<1x16xf32>
    %cst_14 = arith.constant 9.99999993E-9 : f32
    %39 = vector.broadcast %cst_14 : f32 to vector<1x16xf32>
    %40 = arith.addf %38, %39 : vector<1x16xf32>
    %41 = math.rsqrt %40 : vector<1x16xf32>
    %c0_15 = arith.constant 0 : index
    %c0_16 = arith.constant 0 : index
    %42 = vector.load %arg3[%c0_15, %c0_16] : memref<4x1xf32, #tpu.memory_space<vmem>>, vector<4x1xf32>
    %c0_17 = arith.constant 0 : index
    %c0_18 = arith.constant 0 : index
    %43 = vector.load %arg4[%c0_17, %c0_18] : memref<4x1xf32, #tpu.memory_space<vmem>>, vector<4x1xf32>
    %44 = vector.broadcast %29 : vector<1x16xf32> to vector<4x16xf32>
    %45 = arith.subf %4, %44 : vector<4x16xf32>
    %46 = vector.broadcast %41 : vector<1x16xf32> to vector<4x16xf32>
    %47 = arith.mulf %45, %46 : vector<4x16xf32>
    %48 = vector.broadcast %42 : vector<4x1xf32> to vector<4x16xf32>
    %49 = arith.mulf %47, %48 : vector<4x16xf32>
    %50 = vector.broadcast %43 : vector<4x1xf32> to vector<4x16xf32>
    %51 = arith.addf %49, %50 : vector<4x16xf32>
    %c0_19 = arith.constant 0 : index
    %c0_20 = arith.constant 0 : index
    %c0_21 = arith.constant 0 : index
    %52 = vector.load %arg6[%c0_19, %c0_20, %c0_21] : memref<1x4x16xf32, #tpu.memory_space<vmem>>, vector<1x4x16xf32>
    %53 = vector.shape_cast %52 : vector<1x4x16xf32> to vector<4x16xf32>
    %54 = vector.shape_cast %51 : vector<4x16xf32> to vector<1x4x16xf32>
    tpu.vector_store %arg6[%c0_19, %c0_20, %c0_21], %54 {strides = array<i32>} : memref<1x4x16xf32, #tpu.memory_space<vmem>>, vector<1x4x16xf32>,
    return
  }
  func.func @transform_0(%arg0: i32, %arg1: i32) -> (i32, i32, i32) {
    %c0_i32 = arith.constant 0 : i32
    %c0_i32_0 = arith.constant 0 : i32
    return %arg0, %c0_i32, %arg1 : i32, i32, i32
  }
  func.func @transform_1(%arg0: i32, %arg1: i32) -> (i32, i32) {
    %c0_i32 = arith.constant 0 : i32
    %c0_i32_0 = arith.constant 0 : i32
    %c0_i32_1 = arith.constant 0 : i32
    return %c0_i32, %c0_i32_0 : i32, i32
  }
  func.func @transform_2(%arg0: i32, %arg1: i32) -> (i32, i32) {
    %c0_i32 = arith.constant 0 : i32
    %c0_i32_0 = arith.constant 0 : i32
    %c0_i32_1 = arith.constant 0 : i32
    return %c0_i32, %c0_i32_0 : i32, i32
  }
  func.func @transform_3(%arg0: i32, %arg1: i32) -> (i32, i32) {
    %c0_i32 = arith.constant 0 : i32
    %c0_i32_0 = arith.constant 0 : i32
    %c0_i32_1 = arith.constant 0 : i32
    return %c0_i32, %c0_i32_0 : i32, i32
  }
  func.func @transform_4(%arg0: i32, %arg1: i32) -> (i32, i32, i32) {
    %c0_i32 = arith.constant 0 : i32
    %c0_i32_0 = arith.constant 0 : i32
    return %arg0, %c0_i32, %arg1 : i32, i32, i32
  }
}

</mosaic_0001>

<bundles_post_ra>
// kernel: tpu_custom_call.1
= control target key start
LH: loop header
LB: loop body
LE: loop exit
PB: predicated region body
PF: predicated region fallthrough
CT: control target
= control target key end

     0   :  { %9 = vsyncpa [#allocation4], 0  ;;  %s817_s0 = inlined_call_operand.vmem [shape: f32[2,4,16], index: 0, kind: input, shape index: {}]   ;;  %s818_s1 = inlined_call_operand.vmem [shape: f32[4,1], index: 1, kind: input, shape index: {}]   ;;  %s819_s2 = inlined_call_operand.vmem [shape: f32[4,1], index: 2, kind: input, shape index: {}]   ;;  %s820_s3 = inlined_call_operand.hbm [shape: f32[16,16], index: 3, kind: input, shape index: {}]   ;;  %s821_s4 = inlined_call_operand.hbm [shape: f32[2,4,16], index: 4, kind: output, shape index: {}]  }
   0x1   :  { %10 = vsyncpa [#allocation5], 0 }
   0x2   :  { %12 = vsyncpa [#allocation5 + $0x1], 0  ;;  %s700_s15 = smov 0   ;;  %s702_s16 = smov 0  }
   0x3   :  { %s704_s17 = smov 0   ;;  %s706_s18 = smov 0  }
   0x4   :  { %s708_s19 = smov 0   ;;  %s710_s20 = smov 0  }
   0x5 LB: > { %s464_s21 = sadd.s32 4294967295, %s667_s20   ;;  %s465_s22 = sadd.s32 4294967294, %s667_s20   ;;  %s667_s20 = sphi %s710_s20, %s18_s20   ;;  %s663_s19 = sphi %s708_s19, %s828_s19   ;;  %s659_s18 = sphi %s706_s18, %s827_s18   ;;  %s655_s17 = sphi %s704_s17, %s826_s17   ;;  %s651_s16 = sphi %s702_s16, %s825_s16   ;;  %s647_s15 = sphi %s700_s15, %s824_s15  }
   0x6   : > { %s30_s23 = sadd.s32 1, %s663_s19  ;;  %s130_s24 = sadd.s32 1, %s655_s17 }
   0x7   : > { %p32_p0 = scmp.ge.s32.totalorder %s30_s23, 2  ;;  %p140_p1 = scmp.ne.s32.totalorder %s655_s17, %s651_s16 }
   0x8   : > { %p141_p2 = scmp.eq.s32.totalorder %s464_s21, 1  ;;  %p146_p3 = scmp.ne.s32.totalorder %s651_s16, %s647_s15 }
   0x9   : > { %s830_s23 = smov (%p32_p0, %s30_s23), 0  ;;  %p147_p5 = scmp.eq.s32.totalorder %s465_s22, 1 }
   0xa   : > { %p740_p4 = por %p141_p2, %p140_p1  ;;  %s125_s26 = ssub.s32 %s663_s19, %s830_s23 }
   0xb   : > { %p466_p6 = scmp.ge.s32.totalorder %s667_s20, 1  ;;  %p128_p7 = scmp.eq.s32.totalorder %s125_s26, 0 }
   0xc   : > { %p747_p8 = por %p147_p5, %p146_p3  ;;  %p154_p9 = scmp.lt.s32.totalorder %s667_s20, 3 }
   0xd   : > { %s753_s28 = scalar_select %p128_p7, %s655_s17, %s130_s24  }
   0xe   : > { %p155_p10 = pnand %p466_p6, %p154_p9  ;;  %p492_p11 = scmp.eq.s32.totalorder %s464_s21, 0 }
   0xf   : > { %s171_s5 = sshll.u32 %s820_s3, 4  ;;  %s669_s6 = smov [#allocation3]   ;;  %s172_s5 = int_to_ptr.hbm [resolvable:$true] %s171_s5 }
  0x10   : > { %p484_p12 = pneg %p155_p10  ;;  %s173_s7 = sshll.u32 %s669_s6, 4  ;;  %s174_s7 = int_to_ptr.vmem [resolvable:$true] %s173_s7 }
  0x11   : > { %s670_s8 = smov 128   ;;  %s671_s9 = smov 8  }
  0x12   : > { %p485_p13 = pnand %p492_p11, %p484_p12  ;;  %199 = sbr.rel (%p155_p10) target bundleno = 291 (0x123), region = 36 }
  0x14   : > { %487 = dma.hbm_to_vmem [thread:$0]  (!%p485_p13), %s172_s5, 256, %s174_s7, [#allocation4], %s670_s8, %s670_s8, %s671_s9  }
  0x17   : > { %638 = dma.done.wait (%p492_p11), [#allocation4], 256  }
  0x18   : > { %640 = vsyncadd (%p492_p11), [#allocation4], 4294967040  ;;  %vm239_vm0 = vcmask 1024   ;;  %p228_p0 = scmp.lt.s32.totalorder %s659_s18, 1  ;;  %v672_v0 = vmov 0.0   ;;  %v673_v1 = vmov 0   ;;  %v298_v24 = vlaneseq }
  0x19   : > { %240 = vst.msk [vmem:[#allocation2] sm:$0x3] %vm239_vm0, %v672_v0  ;;  %549 = vset.pattern.permute.xlu0 %v673_v1  ;;  %550 = vset.pattern.permute.xlu1 %v673_v1  ;;  %vm242_vm1 = vcmask 125952   ;;  %v261_v2 = vld [vmem:[#allocation3 + $0x8] sm:$0xff]  ;;  %v260_v3 = vld [vmem:[#allocation3] sm:$0xff]  ;;  %vm258_vm2 = vcmask 1040384  }
  0x1a   : > { %s229_s10 = scalar_select %p228_p0, %s659_s18, 1  ;;  %286 = vmatpush.msra.mxu0 %v261_v2  ;;  %v346_v9 = vld [vmem:[%s819_s2] sm:$0xf]  ;;  %vm268_vm3 = vcmask 130048   ;;  %v299_v25 = vand.u32 127, %v298_v24 }
  0x1b   : > { %359 = vperm.xlu1 %550, %v346_v9   ;;  %v345_v15 = vld [vmem:[%s818_s1] sm:$0xf]  ;;  %s674_s29 = smov 113   ;;  %s225_s30 = sand.u32 1, %s651_s16  }
  0x1c   : > { %s472_s11 = sshll.u32 %s229_s10, 2  ;;  %287 = vmatpush.msra.mxu0 %v260_v3  ;;  %v303_v26 = vadd.s32 1, %v299_v25  ;;  %s475_s5 = sshll.u32 %s659_s18, 2 }
  0x1d   : > { %s234_s14 = scalar_lea.vmem %s817_s0, %s472_s11  ;;  %s471_s6 = sshll.u32 %s225_s30, 2 }
  0x1e   : > { %v764_v4 = vld [vmem:[%s234_s14] sm:$0xf]  ;;  %v304_v27 = vcvt.s32.f32 %v303_v26  ;;  %s376_s9 = scalar_lea.hbm %s821_s4, %s475_s5  ;;  %s227_s10 = scalar_lea.vmem [#allocation6], %s471_s6 }
  0x1f   : > { %v243_v5 = vsel %vm242_vm1, %v764_v4, 0.0  ;;  %v250_v6 = vmul.f32 %v764_v4, %v764_v4  ;;  %s378_s11 = sshll.u32 %s227_s10, 4  ;;  %s380_s12 = sshll.u32 %s376_s9, 4  ;;  %s379_s11 = int_to_ptr.vmem [resolvable:$true] %s378_s11  ;;  %s381_s12 = int_to_ptr.hbm [resolvable:$true] %s380_s12 }
  0x20   : > { %v262_v7 = vld [vmem:[#allocation2] sm:$0x3]  ;;  %v244_v8 = vrot.slane %v243_v5, 4  ;;  %v305_v28 = vmul.f32 4.0, %v304_v27  ;;  %s365_s18 = scalar_lea.sflag [#allocation5], %s225_s30  ;;  %s599_s13 = sshra.s32 %s381_s12, 4  ;;  %s600_s13 = int_to_ptr.hbm [resolvable:$true] %s599_s13 }
  0x21   : > { %265 = vperm.xlu0 %549, %v262_v7   ;;  %v251_v10 = vsel %vm242_vm1, %v250_v6, 0.0  ;;  %s601_s14 = scalar_lea.hbm %s600_s13, 4  ;;  %s605_s24 = scalar_lea.hbm %s821_s4, 8 }
  0x22   : > { %v245_v11 = vadd.f32 %v244_v8, %v243_v5  ;;  %v252_v12 = vrot.slane %v251_v10, 4  ;;  %551 = vrcp.f32 %v305_v28  ;;  %vm311_vm4 = vweird.f32 %v305_v28  ;;  %p602_p1 = scmp.ne.s32.totalorder %s600_s13, %s601_s14  ;;  %p606_p5 = scmp.lt.s32.totalorder %s600_s13, %s821_s4 }
  0x23   : > { %v317_v33 = vand.u32 2147483648, %v305_v28  ;;  %v315_v35 = vand.u32 2147483647, %v305_v28  ;;  %p607_p6 = scmp.lt.s32.totalorder %s605_s24, %s601_s14 }
  0x24   : > { %v246_v13 = vrot.slane %v245_v11, 2  ;;  %v253_v14 = vadd.f32 %v252_v12, %v251_v10  ;;  %p603_p2 = pnand %p602_p1, %p740_p4 }
  0x25   : > { %v318_v36 = vor.u32 1.1754944e-38, %v317_v33  ;;  %vm316_vm7 = vcmp.eq.f32.partialorder %v315_v35, 8.507059e+37  ;;  %p608_p7 = por %p607_p6, %p606_p5 }
  0x26   : > { %v247_v16 = vadd.f32 %v246_v13, %v245_v11  ;;  %v254_v17 = vrot.slane %v253_v14, 2  ;;  %p604_p3 = pneg %p603_p2 }
  0x28   : > { %v248_v18 = vrot.slane %v247_v16, 1  ;;  %v255_v19 = vadd.f32 %v254_v17, %v253_v14  ;;  %v552_v29 = vpop.eup %551  ;;  %p609_p9 = pnand %p608_p7, %p604_p3 }
  0x29   : > { %353 = vperm.xlu0 %549, %v345_v15   ;;  %v307_v30 = vmul.f32 %v552_v29, %v305_v28  ;;  %vm312_vm5 = vweird.f32 %v552_v29 }
  0x2a   : > { %v249_v20 = vadd.f32 %v248_v18, %v247_v16  ;;  %v256_v21 = vrot.slane %v255_v19, 1  ;;  %vm313_vm6 = vmor %vm311_vm4, %vm312_vm5 }
  0x2b   : > { %v308_v31 = vsub.f32 1.0, %v307_v30 }
  0x2c   : > { %v257_v22 = vadd.f32 %v256_v21, %v255_v19 }
  0x2d   : > { %v309_v32 = vmul.f32 %v552_v29, %v308_v31 }
  0x2e   : > { %v259_v23 = vsel %vm258_vm2, %v249_v20, %v257_v22 }
  0x2f   : > { %473 = vmatmul.msk.f32.vlgmr.msra.gmra.mxu0 %vm268_vm3, %v259_v23  ;;  %v310_v34 = vadd.f32 %v552_v29, %v309_v32 }
  0x31   : > { %v314_v37 = vsel %vm313_vm6, %v552_v29, %v310_v34 }
  0x32   : > { %v319_v40 = vsel %vm316_vm7, %v318_v36, %v314_v37 }
  0x8d   : > { %v360_v1 = vpop.permute.xlu1 %359 }
  0x93   : > { %v266_v38 = vpop.permute.xlu0 %265 }
  0x9b   : > { %v354_v0 = vpop.permute.xlu0 %353 }
  0xac   : > { %v289_v39 = vpop.f32.mrf.mxu0 }
  0xad   : > { %v290_v41 = vadd.f32 %v289_v39, %v266_v38 }
  0xaf   : > { %v320_v42 = vmul.f32 %v319_v40, %v290_v41  ;;  %293 = vrot.lane.b32.xlu1 %v290_v41, %s674_s29 }
  0xb1   : > { %v321_v43 = vmul.f32 2.0, %v320_v42  ;;  %v328_v46 = vmul.f32 %v320_v42, %v320_v42  ;;  %v347_v58 = vperm.slane %v320_v42, 0 }
  0xb3   : > { %v322_v44 = vmul.f32 %v321_v43, %v290_v41  ;;  %v330_v49 = vrot.slane %v328_v46, 7  ;;  %v348_v61 = vsub.f32 %v764_v4, %v347_v58 }
  0xb5   : > { %v324_v45 = vrot.slane %v322_v44, 7 }
  0xb7   : > { %v326_v47 = vsub.f32 %v290_v41, %v324_v45 }
  0xb9   : > { %v327_v48 = vmul.f32 %v326_v47, %v319_v40 }
  0xbb   : > { %v332_v50 = vadd.f32 %v330_v49, %v327_v48 }
  0xbd   : > { %v333_v51 = vmax.f32 %v332_v50, 0.0 }
  0xbf   : > { %v334_v52 = vadd.f32 1e-08, %v333_v51 }
  0xc1   : > { %553 = vrsqrt.f32 %v334_v52  ;;  %vm341_vm9 = vweird.f32 %v334_v52 }
  0xc7   : > { %v554_v53 = vpop.eup %553 }
  0xc8   : > { %v336_v54 = vmul.f32 %v554_v53, %v334_v52  ;;  %vm342_vm8 = vweird.f32 %v554_v53 }
  0xc9   : > { %vm343_vm10 = vmor %vm341_vm9, %vm342_vm8 }
  0xca   : > { %v337_v55 = vmul.f32 %v554_v53, %v336_v54 }
  0xcc   : > { %v338_v56 = vmul.f32 0.5, %v337_v55 }
  0xce   : > { %v339_v57 = vsub.f32 1.5, %v338_v56 }
  0xd0   : > { %v340_v59 = vmul.f32 %v554_v53, %v339_v57 }
  0xd2   : > { %v344_v60 = vsel %vm343_vm10, %v554_v53, %v340_v59 }
  0xd3   : > { %v349_v62 = vperm.slane %v344_v60, 1 }
  0xd5   : > { %v350_v63 = vmul.f32 %v349_v62, %v348_v61 }
  0xd7   : > { %v356_v2 = vmul.f32 %v354_v0, %v350_v63 }
  0xd9   : > { %v362_v3 = vadd.f32 %v360_v1, %v356_v2 }
  0xdb   : > { %363 = vst.msk [vmem:[%s227_s10] sm:$0xf] %vm242_vm1, %v362_v3 }
  0xdc   : > { %612 = shalt.err (!%p609_p9)
}
  0xdd   : > { %482 = dma.vmem_to_hbm [thread:$0]  (%p740_p4), %s379_s11, 64, %s381_s12, %s365_s18  }
 0x121   : > { %v294_v4 = vpop.permute.xlu1 %293 }
 0x122   : > { %297 = vst.msk [vmem:[#allocation2] sm:$0x3] %vm239_vm0, %v294_v4 }
 0x123 PF: > { %p494_p10 = scmp.ge.s32.totalorder %s667_s20, 2  ;;  %s392_s30 = sand.u32 1, %s647_s15  }
 0x124   : > { %s393_s5 = scalar_lea.sflag [#allocation5], %s392_s30 }
 0x125   : > { %p489_p11 = pnand %p494_p10, %p747_p8 }
 0x127   : > { %p490_p12 = pneg %p489_p11 }
 0x129   : > { %642 = dma.done.wait (%p490_p12), %s393_s5, 64  }
 0x12a   : > { %644 = vsyncadd (%p490_p12), %s393_s5, 4294967232  ;;  %s18_s20 = sadd.s32 1, %s667_s20   ;;  %s824_s15 = smov %s651_s16 }
 0x12b   : > { %p15_p13 = scmp.ge.s32.totalorder %s18_s20, 4   ;;  %s825_s16 = smov %s655_s17 }
 0x12c   : > { %s826_s17 = smov %s753_s28  ;;  %s827_s18 = smov %s663_s19 }
 0x12d   : > { %s828_s19 = smov %s830_s23  ;;  %17 = sbr.rel (!%p15_p13) target bundleno = 5 (0x5), region = 80 }
 0x132   :  { %399 = vsyncpa [#allocation4], 1 }
 0x133   :  { %401 = vsyncpa [#allocation4 + $0x1], 1 }
 0x134   :  { %402 = vsyncpa [#allocation5], 1 }
 0x135   :  { %404 = vsyncpa [#allocation5 + $0x1], 1 }

</bundles_post_ra>
